<compile_context>
chip_gen: v7x
topology: tpu7x:2x2x1
jax: 0.10.0
libtpu: 0.0.40
codegen_flags: <defaults>
</compile_context>

<pallas_src>
import functools

import jax
import jax.numpy as jnp
from jax.experimental import pallas as pl
from jax.experimental.pallas import tpu as pltpu


def _shift_crop_kernel(shift_h_ref, shift_w_ref, x_ref, o_ref, pad_ref, *,
                       h, w, pad_h, pad_w, b_tile):
    """Fused replicate-pad + per-sample integer-shift crop for one batch tile."""
    bt = pl.program_id(0)
    h_pad = h + 2 * pad_h
    w_pad = w + 2 * pad_w
    b_c = x_ref.shape[:2]  # (b_tile, c) — static

    # ---- Build the replicate-padded block once per grid step, vectorized over
    # all samples/channels in the tile. Only static slices / broadcasts, so
    # everything stays on plain (masked) VMEM stores.
    pad_ref[:, :, pad_h:pad_h + h, pad_w:pad_w + w] = x_ref[...]
    if pad_w > 0:
        col_l = x_ref[:, :, :, 0:1]                 # (B, C, h, 1), no relayout
        col_r = x_ref[:, :, :, w - 1:w]
        pad_ref[:, :, pad_h:pad_h + h, 0:pad_w] = jnp.broadcast_to(
            col_l, b_c + (h, pad_w))
        pad_ref[:, :, pad_h:pad_h + h, pad_w + w:w_pad] = jnp.broadcast_to(
            col_r, b_c + (h, pad_w))
    if pad_h > 0:
        # Read the (already W-padded) edge rows so corners replicate correctly.
        row_t = pad_ref[:, :, pad_h:pad_h + 1, :]           # (B, C, 1, w_pad)
        row_b = pad_ref[:, :, pad_h + h - 1:pad_h + h, :]
        pad_ref[:, :, 0:pad_h, :] = jnp.broadcast_to(row_t, b_c + (pad_h, w_pad))
        pad_ref[:, :, pad_h + h:h_pad, :] = jnp.broadcast_to(row_b, b_c + (pad_h, w_pad))

    # ---- Per-sample dynamic crop. b_tile is small and static, so a Python
    # unroll is equivalent to lax.fori_loop(..., unroll=True).
    for i in range(b_tile):
        gb = bt * b_tile + i
        sh = shift_h_ref[gb]            # int32 scalar from SMEM
        sw = shift_w_ref[gb]            # int32 scalar from SMEM
        # Dynamic crop along H (sublane dim) straight off the VMEM scratch.
        rows = pad_ref[i, :, pl.ds(sh, h), :]               # (C, h, w_pad)
        # W (lane dim) shift: static lane slices + select chain — the robust
        # lowering path. TODO(synk): swap for a single dynamic-shift
        # pltpu.roll once dynamic rotates on non-128-wide rows are guaranteed
        # on the target Mosaic version (would move this work to the idle XLU).
        out = rows[:, :, 0:w]
        for k in range(1, 2 * pad_w + 1):
            out = jnp.where(sw == k, rows[:, :, k:k + w], out)
        o_ref[i] = out


def _pick_b_tile(n, per_sample_bytes, *, max_unroll=8, vmem_budget_bytes=4 << 20):
    """Largest divisor of n that fits a conservative VMEM budget (sized for
    v7x's smaller VMEM), keeps the unroll modest, and — when possible — leaves
    >= 2 grid steps so both v7x TensorCores get work."""
    best = 1
    for bt in range(1, min(n, max_unroll) + 1):
        if n % bt:
            continue
        if bt * per_sample_bytes > vmem_budget_bytes:
            continue
        if n >= 2 and n // bt < 2:
            continue
        best = bt
    return best


def random_shifts_aug(x, pad_h, pad_w, key):
    """JAX/Pallas equivalent of RandomShiftsAug.forward.

    x: (n, ..., h, w) float array.  Returns (augmented x, (shift_h, shift_w)).
    """
    orig_shape = x.shape
    n, h, w = x.shape[0], x.shape[-2], x.shape[-1]
    xr = x.reshape(n, -1, h, w)
    c = xr.shape[1]
    h_pad, w_pad = h + 2 * pad_h, w + 2 * pad_w

    # TODO(synk): torch.randint's RNG stream cannot be matched bit-for-bit;
    # we draw the integer shifts with jax.random (same distribution).
    kh, kw = jax.random.split(key)
    shift_h = jax.random.randint(kh, (n,), 0, 2 * pad_h + 1, dtype=jnp.int32)
    shift_w = jax.random.randint(kw, (n,), 0, 2 * pad_w + 1, dtype=jnp.int32)

    itemsize = jnp.dtype(xr.dtype).itemsize
    # in + out blocks (double-buffered by the pipeline) + padded VMEM scratch.
    per_sample = (2 * 2 * c * h * w + c * h_pad * w_pad) * itemsize
    b_tile = _pick_b_tile(n, per_sample)
    grid = (n // b_tile,)

    kernel = functools.partial(_shift_crop_kernel, h=h, w=w,
                               pad_h=pad_h, pad_w=pad_w, b_tile=b_tile)

    out = pl.pallas_call(
        kernel,
        out_shape=jax.ShapeDtypeStruct((n, c, h, w), xr.dtype),
        grid_spec=pltpu.PrefetchScalarGridSpec(
            num_scalar_prefetch=2,
            grid=grid,
            in_specs=[
                pl.BlockSpec((b_tile, c, h, w), lambda b, sh, sw: (b, 0, 0, 0)),
            ],
            out_specs=pl.BlockSpec((b_tile, c, h, w), lambda b, sh, sw: (b, 0, 0, 0)),
            scratch_shapes=[pltpu.VMEM((b_tile, c, h_pad, w_pad), xr.dtype)],
        ),
        compiler_params=pltpu.CompilerParams(
            dimension_semantics=("parallel",)),
    )(shift_h, shift_w, xr)

    return out.reshape(orig_shape), (shift_h, shift_w)


def _reference(x, pad_h, pad_w, shift_h, shift_w):
    """Pure-JAX reference (what grid_sample with integer shifts computes)."""
    n, h, w = x.shape[0], x.shape[-2], x.shape[-1]
    xr = x.reshape(n, -1, h, w)
    xp = jnp.pad(xr, ((0, 0), (0, 0), (pad_h, pad_h), (pad_w, pad_w)), mode="edge")

    def per_b(img, sh, sw):
        return jax.lax.dynamic_slice(img, (0, sh, sw), (img.shape[0], h, w))

    out = jax.vmap(per_b)(xp, shift_h, shift_w)
    return out.reshape(x.shape)


def _run_case(key, shape, pad_h, pad_w):
    kx, kaug = jax.random.split(key)
    x = jax.random.normal(kx, shape, dtype=jnp.float32)
    out, (shift_h, shift_w) = random_shifts_aug(x, pad_h, pad_w, kaug)
    out = jax.block_until_ready(out)
    ref = _reference(x, pad_h, pad_w, shift_h, shift_w)
    assert out.shape == x.shape and out.dtype == x.dtype
    assert jnp.allclose(out, ref, atol=0.0, rtol=0.0), "mismatch vs reference"


if __name__ == "__main__":
    key = jax.random.PRNGKey(0)
    k1, k2 = jax.random.split(key)

    # Module __init__ args (RandomShiftsAug(pad_h, pad_w)); small NCHW input.
    _run_case(k1, (2, 4, 16, 16), pad_h=2, pad_w=3)
    # Larger batch to exercise batch tiling (b_tile > 1) and a different pad.
    _run_case(k2, (8, 3, 16, 16), pad_h=3, pad_w=2)

    print("KERNEL_OK")
</pallas_src>

<mosaic_0001>
module attributes {stable_mosaic.version = 11 : i64} {
  func.func @_shift_crop_kernel(%arg0: i32, %arg1: memref<2xi32, #tpu.memory_space<smem>>, %arg2: memref<2xi32, #tpu.memory_space<smem>>, %arg3: memref<1x4x16x16xf32, #tpu.memory_space<vmem>>, %arg4: memref<1x4x16x16xf32, #tpu.memory_space<vmem>>, %arg5: memref<1x4x20x22xf32, #tpu.memory_space<vmem>>) attributes {dimension_semantics = [#tpu.dimension_semantics<parallel>], iteration_bounds = array<i64: 2>, scalar_prefetch = 2 : i64, scratch_operands = 1 : i64, tpu.core_type = #tpu.core_type<tc>, window_params = [{transform_indices = @transform_0, window_bounds = array<i64: 1, 4, 16, 16>}, {transform_indices = @transform_1, window_bounds = array<i64: 1, 4, 16, 16>}]} {
    %c0 = arith.constant 0 : index
    %c0_0 = arith.constant 0 : index
    %c0_1 = arith.constant 0 : index
    %c0_2 = arith.constant 0 : index
    %0 = vector.load %arg3[%c0, %c0_0, %c0_1, %c0_2] : memref<1x4x16x16xf32, #tpu.memory_space<vmem>>, vector<1x4x16x16xf32>
    %c0_3 = arith.constant 0 : index
    %c0_4 = arith.constant 0 : index
    %c2 = arith.constant 2 : index
    %c3 = arith.constant 3 : index
    %1 = vector.load %arg5[%c0_3, %c0_4, %c2, %c3] : memref<1x4x20x22xf32, #tpu.memory_space<vmem>>, vector<1x4x16x16xf32>
    tpu.vector_store %arg5[%c0_3, %c0_4, %c2, %c3], %0 {strides = array<i32>} : memref<1x4x20x22xf32, #tpu.memory_space<vmem>>, vector<1x4x16x16xf32>,
    %c0_5 = arith.constant 0 : index
    %c0_6 = arith.constant 0 : index
    %c0_7 = arith.constant 0 : index
    %c0_8 = arith.constant 0 : index
    %2 = vector.load %arg3[%c0_5, %c0_6, %c0_7, %c0_8] : memref<1x4x16x16xf32, #tpu.memory_space<vmem>>, vector<1x4x16x1xf32>
    %c0_9 = arith.constant 0 : index
    %c0_10 = arith.constant 0 : index
    %c0_11 = arith.constant 0 : index
    %c15 = arith.constant 15 : index
    %3 = vector.load %arg3[%c0_9, %c0_10, %c0_11, %c15] : memref<1x4x16x16xf32, #tpu.memory_space<vmem>>, vector<1x4x16x1xf32>
    %4 = vector.shape_cast %2 : vector<1x4x16x1xf32> to vector<1x4x16x1xf32>
    %5 = vector.broadcast %4 : vector<1x4x16x1xf32> to vector<1x4x16x3xf32>
    %c0_12 = arith.constant 0 : index
    %c0_13 = arith.constant 0 : index
    %c2_14 = arith.constant 2 : index
    %c0_15 = arith.constant 0 : index
    %6 = vector.load %arg5[%c0_12, %c0_13, %c2_14, %c0_15] : memref<1x4x20x22xf32, #tpu.memory_space<vmem>>, vector<1x4x16x3xf32>
    tpu.vector_store %arg5[%c0_12, %c0_13, %c2_14, %c0_15], %5 {strides = array<i32>} : memref<1x4x20x22xf32, #tpu.memory_space<vmem>>, vector<1x4x16x3xf32>,
    %7 = vector.shape_cast %3 : vector<1x4x16x1xf32> to vector<1x4x16x1xf32>
    %8 = vector.broadcast %7 : vector<1x4x16x1xf32> to vector<1x4x16x3xf32>
    %c0_16 = arith.constant 0 : index
    %c0_17 = arith.constant 0 : index
    %c2_18 = arith.constant 2 : index
    %c19 = arith.constant 19 : index
    %9 = vector.load %arg5[%c0_16, %c0_17, %c2_18, %c19] : memref<1x4x20x22xf32, #tpu.memory_space<vmem>>, vector<1x4x16x3xf32>
    tpu.vector_store %arg5[%c0_16, %c0_17, %c2_18, %c19], %8 {strides = array<i32>} : memref<1x4x20x22xf32, #tpu.memory_space<vmem>>, vector<1x4x16x3xf32>,
    %c0_19 = arith.constant 0 : index
    %c0_20 = arith.constant 0 : index
    %c2_21 = arith.constant 2 : index
    %c0_22 = arith.constant 0 : index
    %10 = vector.load %arg5[%c0_19, %c0_20, %c2_21, %c0_22] : memref<1x4x20x22xf32, #tpu.memory_space<vmem>>, vector<1x4x1x22xf32>
    %c0_23 = arith.constant 0 : index
    %c0_24 = arith.constant 0 : index
    %c17 = arith.constant 17 : index
    %c0_25 = arith.constant 0 : index
    %11 = vector.load %arg5[%c0_23, %c0_24, %c17, %c0_25] : memref<1x4x20x22xf32, #tpu.memory_space<vmem>>, vector<1x4x1x22xf32>
    %12 = vector.shape_cast %10 : vector<1x4x1x22xf32> to vector<1x4x1x22xf32>
    %13 = vector.broadcast %12 : vector<1x4x1x22xf32> to vector<1x4x2x22xf32>
    %c0_26 = arith.constant 0 : index
    %c0_27 = arith.constant 0 : index
    %c0_28 = arith.constant 0 : index
    %c0_29 = arith.constant 0 : index
    %14 = vector.load %arg5[%c0_26, %c0_27, %c0_28, %c0_29] : memref<1x4x20x22xf32, #tpu.memory_space<vmem>>, vector<1x4x2x22xf32>
    tpu.vector_store %arg5[%c0_26, %c0_27, %c0_28, %c0_29], %13 {strides = array<i32>} : memref<1x4x20x22xf32, #tpu.memory_space<vmem>>, vector<1x4x2x22xf32>,
    %15 = vector.shape_cast %11 : vector<1x4x1x22xf32> to vector<1x4x1x22xf32>
    %16 = vector.broadcast %15 : vector<1x4x1x22xf32> to vector<1x4x2x22xf32>
    %c0_30 = arith.constant 0 : index
    %c0_31 = arith.constant 0 : index
    %c18 = arith.constant 18 : index
    %c0_32 = arith.constant 0 : index
    %17 = vector.load %arg5[%c0_30, %c0_31, %c18, %c0_32] : memref<1x4x20x22xf32, #tpu.memory_space<vmem>>, vector<1x4x2x22xf32>
    tpu.vector_store %arg5[%c0_30, %c0_31, %c18, %c0_32], %16 {strides = array<i32>} : memref<1x4x20x22xf32, #tpu.memory_space<vmem>>, vector<1x4x2x22xf32>,
    %c1_i32 = arith.constant 1 : i32
    %18 = arith.muli %arg0, %c1_i32 : i32
    %c0_i32 = arith.constant 0 : i32
    %19 = arith.addi %18, %c0_i32 : i32
    %20 = arith.index_cast %19 : i32 to index
    %21 = memref.load %arg1[%20] : memref<2xi32, #tpu.memory_space<smem>>
    %22 = arith.index_cast %19 : i32 to index
    %23 = memref.load %arg2[%22] : memref<2xi32, #tpu.memory_space<smem>>
    %c0_33 = arith.constant 0 : index
    %c0_34 = arith.constant 0 : index
    %24 = arith.index_cast %21 : i32 to index
    %c0_35 = arith.constant 0 : index
    %25 = vector.load %arg5[%c0_33, %c0_34, %24, %c0_35] : memref<1x4x20x22xf32, #tpu.memory_space<vmem>>, vector<1x4x16x22xf32>
    %26 = vector.shape_cast %25 : vector<1x4x16x22xf32> to vector<4x16x22xf32>
    %27 = vector.extract_strided_slice %26 {offsets = [0, 0, 0], sizes = [4, 16, 16], strides = [1, 1, 1]} : vector<4x16x22xf32> to vector<4x16x16xf32>
    %c1_i32_36 = arith.constant 1 : i32
    %28 = arith.cmpi eq, %23, %c1_i32_36 : i32
    %29 = vector.extract_strided_slice %26 {offsets = [0, 0, 1], sizes = [4, 16, 16], strides = [1, 1, 1]} : vector<4x16x22xf32> to vector<4x16x16xf32>
    %30 = arith.select %28, %29, %27 : vector<4x16x16xf32>
    %c2_i32 = arith.constant 2 : i32
    %31 = arith.cmpi eq, %23, %c2_i32 : i32
    %32 = vector.extract_strided_slice %26 {offsets = [0, 0, 2], sizes = [4, 16, 16], strides = [1, 1, 1]} : vector<4x16x22xf32> to vector<4x16x16xf32>
    %33 = arith.select %31, %32, %30 : vector<4x16x16xf32>
    %c3_i32 = arith.constant 3 : i32
    %34 = arith.cmpi eq, %23, %c3_i32 : i32
    %35 = vector.extract_strided_slice %26 {offsets = [0, 0, 3], sizes = [4, 16, 16], strides = [1, 1, 1]} : vector<4x16x22xf32> to vector<4x16x16xf32>
    %36 = arith.select %34, %35, %33 : vector<4x16x16xf32>
    %c4_i32 = arith.constant 4 : i32
    %37 = arith.cmpi eq, %23, %c4_i32 : i32
    %38 = vector.extract_strided_slice %26 {offsets = [0, 0, 4], sizes = [4, 16, 16], strides = [1, 1, 1]} : vector<4x16x22xf32> to vector<4x16x16xf32>
    %39 = arith.select %37, %38, %36 : vector<4x16x16xf32>
    %c5_i32 = arith.constant 5 : i32
    %40 = arith.cmpi eq, %23, %c5_i32 : i32
    %41 = vector.extract_strided_slice %26 {offsets = [0, 0, 5], sizes = [4, 16, 16], strides = [1, 1, 1]} : vector<4x16x22xf32> to vector<4x16x16xf32>
    %42 = arith.select %40, %41, %39 : vector<4x16x16xf32>
    %c6_i32 = arith.constant 6 : i32
    %43 = arith.cmpi eq, %23, %c6_i32 : i32
    %44 = vector.extract_strided_slice %26 {offsets = [0, 0, 6], sizes = [4, 16, 16], strides = [1, 1, 1]} : vector<4x16x22xf32> to vector<4x16x16xf32>
    %45 = arith.select %43, %44, %42 : vector<4x16x16xf32>
    %c0_37 = arith.constant 0 : index
    %c0_38 = arith.constant 0 : index
    %c0_39 = arith.constant 0 : index
    %c0_40 = arith.constant 0 : index
    %46 = vector.load %arg4[%c0_37, %c0_38, %c0_39, %c0_40] : memref<1x4x16x16xf32, #tpu.memory_space<vmem>>, vector<1x4x16x16xf32>
    %47 = vector.shape_cast %46 : vector<1x4x16x16xf32> to vector<4x16x16xf32>
    %48 = vector.shape_cast %45 : vector<4x16x16xf32> to vector<1x4x16x16xf32>
    tpu.vector_store %arg4[%c0_37, %c0_38, %c0_39, %c0_40], %48 {strides = array<i32>} : memref<1x4x16x16xf32, #tpu.memory_space<vmem>>, vector<1x4x16x16xf32>,
    return
  }
  func.func @transform_0(%arg0: i32, %arg1: memref<2xi32, #tpu.memory_space<smem>>, %arg2: memref<2xi32, #tpu.memory_space<smem>>) -> (i32, i32, i32, i32) {
    %c0_i32 = arith.constant 0 : i32
    %c0_i32_0 = arith.constant 0 : i32
    %c0_i32_1 = arith.constant 0 : i32
    %c0_i32_2 = arith.constant 0 : i32
    return %arg0, %c0_i32, %c0_i32_0, %c0_i32_1 : i32, i32, i32, i32
  }
  func.func @transform_1(%arg0: i32, %arg1: memref<2xi32, #tpu.memory_space<smem>>, %arg2: memref<2xi32, #tpu.memory_space<smem>>) -> (i32, i32, i32, i32) {
    %c0_i32 = arith.constant 0 : i32
    %c0_i32_0 = arith.constant 0 : i32
    %c0_i32_1 = arith.constant 0 : i32
    %c0_i32_2 = arith.constant 0 : i32
    return %arg0, %c0_i32, %c0_i32_0, %c0_i32_1 : i32, i32, i32, i32
  }
}

</mosaic_0001>

<bundles_post_ra>
// kernel: tpu_custom_call.1
= control target key start
LH: loop header
LB: loop body
LE: loop exit
PB: predicated region body
PF: predicated region fallthrough
CT: control target
= control target key end

     0   :  { %s1456_s0 = inlined_call_operand.hbm [shape: s32[2], index: 0, kind: input, shape index: {}]   ;;  %s1457_s2 = inlined_call_operand.hbm [shape: f32[2,4,16,16], index: 2, kind: input, shape index: {}]   ;;  %s1458_s3 = inlined_call_operand.hbm [shape: f32[2,4,16,16], index: 3, kind: output, shape index: {}]   ;;  %s1459_s1 = inlined_call_operand.vmem [shape: s32[2], index: 1, kind: input, shape index: {}]  }
   0x1   :  { %s830_s14 = scalar_lea.hbm %s1456_s0, 16 }
   0x2   :  { %p831_p0 = scmp.ne.s32.totalorder %s1456_s0, %s830_s14  ;;  %p834_p1 = scmp.lt.u32.totalorder %s830_s14, %s1456_s0 }
   0x4   :  { %p836_p2 = pnand %p834_p1, %p831_p0 }
   0x6   :  { %839 = shalt.err (!%p836_p2)  }
   0x7   :  { %s952_s19 = smov [#allocation4]   ;;  %s10_s24 = sshll.u32 %s1459_s1, 4  ;;  %s11_s24 = int_to_ptr.vmem [resolvable:$true] %s10_s24 }
   0x8   :  { %9 = dma.hbm_to_smem %s1456_s0, 16, %s952_s19, [#allocation3] }
   0x9   :  { %s840_s25 = scalar_lea.vmem %s11_s24, 16  ;;  %p845_p4 = scmp.lt.s32.totalorder %s11_s24, %s11_s24 }
   0xa   :  { %p841_p3 = scmp.ne.s32.totalorder %s11_s24, %s840_s25  ;;  %p846_p5 = scmp.lt.s32.totalorder %s840_s25, %s840_s25 }
   0xc   :  { %p847_p6 = por %p846_p5, %p845_p4 }
   0xe   :  { %p848_p7 = pnand %p847_p6, %p841_p3 }
  0x10   :  { %851 = shalt.err (!%p848_p7)  }
  0x11   :  { %s953_s26 = smov [#allocation5]  }
  0x12   :  { %13 = dma.vmem_to_smem %s11_s24, 16, %s953_s26, [#allocation3] }
  0x13   :  { %926 = dma.done.wait [#allocation3], 32 }
  0x14   :  { %927 = vsyncadd [#allocation3], 4294967264 }
  0x15   :  { %15 = sfence }
  0x16   :  { %16 = vsyncpa [#allocation7], 0 }
  0x17   :  { %18 = vsyncpa [#allocation7 + $0x1], 0 }
  0x18   :  { %19 = vsyncpa [#allocation8], 0 }
  0x19   :  { %21 = vsyncpa [#allocation8 + $0x1], 0  ;;  %s1000_s0 = smov 0   ;;  %s1002_s1 = smov 0  }
  0x1a   :  { %s1004_s27 = smov 0   ;;  %s1006_s28 = smov 0  }
  0x1b LB: > { %s1021_s29 = sadd.s32 4294967295, %s950_s28   ;;  %s745_s30 = sadd.s32 4294967294, %s950_s28   ;;  %s950_s28 = sphi %s1006_s28, %s1484_s28   ;;  %s946_s27 = sphi %s1004_s27, %s1483_s27   ;;  %s942_s1 = sphi %s1002_s1, %s1482_s1   ;;  %s938_s0 = sphi %s1000_s0, %s1481_s0  }
  0x1c   : > { %s1025_s4 = sadd.s32 1, %s950_s28   ;;  %s34_s5 = sadd.s32 1, %s946_s27 }
  0x1d   : > { %s31_s6 = ssub.s32 %s950_s28, %s1025_s4  ;;  %p41_p8 = scmp.ne.s32.totalorder %s946_s27, %s942_s1 }
  0x1e   : > { %p32_p9 = scmp.eq.s32.totalorder %s31_s6, 0  ;;  %p42_p10 = scmp.eq.s32.totalorder %s950_s28, 0 }
  0x1f   : > { %p47_p11 = scmp.ne.s32.totalorder %s942_s1, %s938_s0  ;;  %p48_p12 = scmp.eq.s32.totalorder %s1021_s29, 0 }
  0x20   : > { %s1037_s7 = scalar_select %p32_p9, %s946_s27, %s34_s5  }
  0x21   : > { %p1039_p13 = por %p42_p10, %p41_p8  ;;  %p1043_p0 = por %p48_p12, %p47_p11 }
  0x22   : > { %p71_p1 = scmp.eq.s32.totalorder %s1021_s29, 1  ;;  %p77_p2 = scmp.eq.s32.totalorder %s745_s30, 1 }
  0x23   : > { %p781_p4 = scmp.lt.s32.totalorder %s950_s28, 2  ;;  %s97_s12 = sand.u32 1, %s946_s27  }
  0x24   : > { %p1050_p5 = por %p71_p1, %p41_p8  ;;  %p1054_p6 = por %p77_p2, %p47_p11 }
  0x25   : > { %s767_s13 = sshll.u32 %s950_s28, 10  ;;  %s748_s14 = sshll.u32 %s97_s12, 6 }
  0x26   : > { %s1463_s10 = scalar_select %p1050_p5, 1, 0 }
  0x27   : > { %s1464_s11 = scalar_select %p1054_p6, 1, 0 }
  0x28   : > { %s1063_s17 = scalar_lea.hbm %s1457_s2, %s767_s13  ;;  %s101_s18 = scalar_lea.vmem [#allocation6], %s748_s14 }
  0x29   : > { %s108_s19 = sshll.u32 %s101_s18, 4  ;;  %p1067_p7 = pnand %p781_p4, %p1039_p13  ;;  %s1071_s19 = int_to_ptr.vmem [resolvable:$true] %s108_s19 }
  0x2a   : > { %s1073_s21 = scalar_lea.sflag [#allocation7], %s97_s12  ;;  %s852_s22 = scalar_lea.hbm %s1063_s17, 1024 }
  0x2b   : > { %p853_p8 = scmp.ne.s32.totalorder %s1063_s17, %s852_s22  ;;  %p854_p9 = pneg %p1067_p7 }
  0x2c   : > { %s857_s25 = scalar_lea.hbm %s1457_s2, 2048  ;;  %p858_p12 = scmp.lt.u32.totalorder %s1063_s17, %s1457_s2 }
  0x2d   : > { %p855_p10 = pnand %p854_p9, %p853_p8  ;;  %p859_p13 = scmp.lt.u32.totalorder %s857_s25, %s852_s22 }
  0x2e   : > { %p861_p2 = scmp.lt.u32.totalorder %s852_s22, %s1063_s17 }
  0x2f   : > { %p856_p11 = pneg %p855_p10  ;;  %p860_p1 = por %p859_p13, %p858_p12 }
  0x31   : > { %p862_p4 = por %p861_p2, %p860_p1 }
  0x33   : > { %p863_p3 = pnand %p862_p4, %p856_p11 }
  0x35   : > { %866 = shalt.err (!%p863_p3)
}
  0x36   : > { %s867_s5 = scalar_lea.vmem %s1071_s19, 1024  ;;  %s954_s6 = smov [#allocation6]  }
  0x37   : > { %p868_p8 = scmp.ne.s32.totalorder %s1071_s19, %s867_s5  ;;  %s872_s8 = sshll.u32 %s954_s6, 4  ;;  %s873_s8 = int_to_ptr.vmem [resolvable:$false] %s872_s8 }
  0x38   : > { %s874_s12 = scalar_lea.vmem %s873_s8, 2048  ;;  %p875_p5 = scmp.lt.s32.totalorder %s1071_s19, %s873_s8 }
  0x39   : > { %p870_p10 = pnand %p868_p8, %p854_p9  ;;  %p876_p12 = scmp.lt.s32.totalorder %s874_s12, %s867_s5 }
  0x3b   : > { %p871_p6 = pneg %p870_p10  ;;  %p877_p13 = por %p876_p12, %p875_p5 }
  0x3d   : > { %p878_p1 = pnand %p877_p13, %p871_p6 }
  0x3f   : > { %881 = shalt.err (!%p878_p1)
}
  0x40   : > { %s955_s13 = smov 128   ;;  %s956_s14 = smov 8  }
  0x41   : > { %776 = dma.hbm_to_vmem [thread:$0]  (!%p1067_p7), %s1063_s17, 1024, %s1071_s19, %s1073_s21, %s955_s13, %s955_s13, %s956_s14  }
  0x42   : > { %p751_p3 = scmp.ge.s32.totalorder %s950_s28, 1  ;;  %p116_p9 = scmp.lt.s32.totalorder %s950_s28, 3 }
  0x44   : > { %p117_p11 = pnand %p751_p3, %p116_p9 }
  0x45   : > { %s1104_s15 = sand.u32 (!%p117_p11), 1, %s942_s1  }
  0x46   : > { %120 = sbr.rel (%p117_p11) target bundleno = 1109 (0x455), region = 24  ;;  %s752_s16 = sshll.u32 (!%p117_p11), %s1104_s15, 6 }
  0x47   : > { %s123_s18 = scalar_lea.sflag (!%p117_p11), [#allocation7], %s1104_s15  ;;  %s126_s22 = scalar_lea.vmem (!%p117_p11), [#allocation6], %s752_s16 }
  0x4d   : > { %929 = dma.done.wait (%p1043_p0), %s123_s18, 1024  }
  0x4e   : > { %931 = vsyncadd (%p1043_p0), %s123_s18, 4294966272  ;;  %v957_v0 = vmov 0   ;;  %v196_v1 = vld [vmem:[%s126_s22 + $0x10] sm:$0xff]  ;;  %v194_v2 = vld [vmem:[%s126_s22] sm:$0xff]  ;;  %v958_v9 = vmov 15   ;;  %s959_s9 = smov 3  }
  0x4f   : > { %827 = vset.pattern.permute.xlu1 %v957_v0  ;;  %826 = vset.pattern.permute.xlu0 %v957_v0  ;;  %v197_v3 = vld [vmem:[%s126_s22 + $0x18] sm:$0xff]  ;;  %v195_v4 = vld [vmem:[%s126_s22 + $0x8] sm:$0xff]  ;;  %v198_v6 = vld [vmem:[%s126_s22 + $0x20] sm:$0xff]  ;;  %vm185_vm0 = vcmask 154648   ;;  %vm242_vm1 = vcmask 23552   ;;  %vm283_vm2 = vcmask 179352  }
  0x50   : > { %214 = vperm.xlu1 %827, %v196_v1   ;;  %204 = vperm.xlu0 %826, %v194_v2   ;;  %v199_v5 = vld [vmem:[%s126_s22 + $0x28] sm:$0xff]  ;;  %v201_v7 = vld [vmem:[%s126_s22 + $0x38] sm:$0xff]  ;;  %v200_v8 = vld [vmem:[%s126_s22 + $0x30] sm:$0xff]  ;;  %vm316_vm3 = vcmask 173056   ;;  %s341_s17 = sld [smem:[#allocation4 + %s1021_s29]]  ;;  %s960_s20 = smov 1  }
  0x51   : > { %s1180_s21 = sld [smem:[#allocation5 + %s1021_s29]]  ;;  %s961_s6 = smov 122   ;;  %vm648_vm10 = vcmask 130048  }
  0x52   : > { %s144_s8 = scalar_lea.vmem [#allocation9], %s752_s16  ;;  %s768_s13 = sshll.u32 %s1021_s29, 10 }
  0x53   : > { %s671_s12 = sshll.u32 %s144_s8, 4  ;;  %s1410_s18 = scalar_lea.hbm %s1458_s3, %s768_s13  ;;  %s1403_s12 = int_to_ptr.vmem [resolvable:$true] %s671_s12 }
  0x54   : > { %219 = vperm.xlu1 %827, %v197_v3   ;;  %209 = vperm.xlu0 %826, %v195_v4   ;;  %s658_s29 = scalar_lea.sflag [#allocation8], %s1104_s15  ;;  %s882_s22 = scalar_lea.vmem %s1403_s12, 1024 }
  0x55   : > { %p883_p8 = scmp.ne.s32.totalorder %s1403_s12, %s882_s22  ;;  %p1478_p10 = scmp.ne.s32.totalorder %s1463_s10, 0 }
  0x56   : > { %s343_s19 = scalar_lea.vmem [#allocation2], %s341_s17 }
  0x57   : > { %p352_p0 = scmp.eq.s32.totalorder %s1180_s21, 1  ;;  %p396_p5 = scmp.eq.s32.totalorder %s1180_s21, 2 }
  0x58   : > { %229 = vperm.xlu1 %827, %v199_v5   ;;  %224 = vperm.xlu0 %826, %v198_v6   ;;  %p440_p6 = scmp.eq.s32.totalorder %s1180_s21, 3  ;;  %p484_p7 = scmp.eq.s32.totalorder %s1180_s21, 4 }
  0x59   : > { %s353_s23 = scalar_select %p352_p0, 1, 0 }
  0x5a   : > { %s397_s24 = scalar_select %p396_p5, 1, 0 }
  0x5b   : > { %v354_v50 = vstv %s353_s23  ;;  %s441_s25 = scalar_select %p440_p6, 1, 0 }
  0x5c   : > { %239 = vperm.xlu1 %827, %v201_v7   ;;  %234 = vperm.xlu0 %826, %v200_v8   ;;  %vm1183_vm4 = vcmp.eq.s32.totalorder %v354_v50, 1  ;;  %s485_s26 = scalar_select %p484_p7, 1, 0 }
  0x5d   : > { %p528_p2 = scmp.eq.s32.totalorder %s1180_s21, 5  ;;  %p572_p4 = scmp.eq.s32.totalorder %s1180_s21, 6 }
  0x5e   : > { %p884_p12 = pnand %p883_p8, %p1478_p10 }
  0x5f   : > { %s529_s30 = scalar_select %p528_p2, 1, 0 }
  0x60   : > { %829 = vset.pattern.permute.xlu1 %v958_v9  ;;  %828 = vset.pattern.permute.xlu0 %v958_v9  ;;  %s573_s5 = scalar_select %p572_p4, 1, 0 }
  0x61   : > { %256 = vperm.xlu1 %829, %v195_v4   ;;  %252 = vperm.xlu0 %828, %v194_v2   ;;  %p885_p13 = pneg %p884_p12 }
  0x65   : > { %260 = vperm.xlu1 %829, %v196_v1   ;;  %264 = vperm.xlu0 %828, %v197_v3  }
  0x69   : > { %268 = vperm.xlu1 %829, %v198_v6   ;;  %272 = vperm.xlu0 %828, %v199_v5  }
  0x6d   : > { %276 = vperm.xlu1 %829, %v200_v8   ;;  %280 = vperm.xlu0 %828, %v201_v7  }
  0x71   : > { %163 = vrot.lane.b32.xlu0 %v195_v4, %s959_s9  ;;  %161 = vrot.lane.b32.xlu1 %v194_v2, %s959_s9  ;;  %v398_v4 = vstv %s397_s24 }
  0x72   : > { %vm1220_vm5 = vcmp.eq.s32.totalorder %v398_v4, 1 }
  0x75   : > { %167 = vrot.lane.b32.xlu0 %v197_v3, %s959_s9  ;;  %165 = vrot.lane.b32.xlu1 %v196_v1, %s959_s9 }
  0x79   : > { %171 = vrot.lane.b32.xlu0 %v199_v5, %s959_s9  ;;  %169 = vrot.lane.b32.xlu1 %v198_v6, %s959_s9 }
  0x7d   : > { %175 = vrot.lane.b32.xlu0 %v201_v7, %s959_s9  ;;  %173 = vrot.lane.b32.xlu1 %v200_v8, %s959_s9  ;;  %s962_s9 = smov [#allocation9]  }
  0x7e   : > { %s886_s17 = sshll.u32 %s962_s9, 4  ;;  %s887_s17 = int_to_ptr.vmem [resolvable:$false] %s886_s17 }
  0x7f   : > { %p889_p1 = scmp.lt.s32.totalorder %s1403_s12, %s887_s17 }
  0xcf   : > { %v215_v10 = vpop.permute.xlu1 %214  ;;  %v205_v11 = vpop.permute.xlu0 %204 }
  0xd3   : > { %v220_v12 = vpop.permute.xlu1 %219  ;;  %v210_v13 = vpop.permute.xlu0 %209 }
  0xd7   : > { %v230_v14 = vpop.permute.xlu1 %229  ;;  %v225_v15 = vpop.permute.xlu0 %224 }
  0xdb   : > { %v240_v16 = vpop.permute.xlu1 %239  ;;  %v235_v17 = vpop.permute.xlu0 %234 }
  0xe0   : > { %v257_v18 = vpop.permute.xlu1 %256  ;;  %v253_v19 = vpop.permute.xlu0 %252 }
  0xe4   : > { %v261_v20 = vpop.permute.xlu1 %260  ;;  %v265_v21 = vpop.permute.xlu0 %264 }
  0xe8   : > { %v269_v22 = vpop.permute.xlu1 %268  ;;  %v273_v23 = vpop.permute.xlu0 %272 }
  0xec   : > { %v277_v24 = vpop.permute.xlu1 %276  ;;  %v281_v25 = vpop.permute.xlu0 %280 }
  0xf0   : > { %v164_v26 = vpop.permute.xlu0 %163  ;;  %v162_v27 = vpop.permute.xlu1 %161 }
  0xf1   : > { %187 = vst.msk [vmem:[#allocation2 + $0xa] sm:$0xff] %vm185_vm0, %v164_v26  ;;  %186 = vst.msk [vmem:[#allocation2 + $0x2] sm:$0xff] %vm185_vm0, %v162_v27 }
  0xf2   : > { %244 = vst.msk [vmem:[#allocation2 + $0xa] sm:$0xff] %vm242_vm1, %v210_v13  ;;  %243 = vst.msk [vmem:[#allocation2 + $0x2] sm:$0xff] %vm242_vm1, %v205_v11 }
  0xf3   : > { %285 = vst.msk [vmem:[#allocation2 + $0xa] sm:$0xff] %vm283_vm2, %v257_v18  ;;  %284 = vst.msk [vmem:[#allocation2 + $0x2] sm:$0xff] %vm283_vm2, %v253_v19 }
  0xf4   : > { %v168_v28 = vpop.permute.xlu0 %167  ;;  %v166_v29 = vpop.permute.xlu1 %165 }
  0xf5   : > { %189 = vst.msk [vmem:[#allocation2 + $0x22] sm:$0xff] %vm185_vm0, %v168_v28  ;;  %188 = vst.msk [vmem:[#allocation2 + $0x1a] sm:$0xff] %vm185_vm0, %v166_v29 }
  0xf6   : > { %246 = vst.msk [vmem:[#allocation2 + $0x22] sm:$0xff] %vm242_vm1, %v220_v12  ;;  %245 = vst.msk [vmem:[#allocation2 + $0x1a] sm:$0xff] %vm242_vm1, %v215_v10 }
  0xf7   : > { %287 = vst.msk [vmem:[#allocation2 + $0x22] sm:$0xff] %vm283_vm2, %v265_v21  ;;  %286 = vst.msk [vmem:[#allocation2 + $0x1a] sm:$0xff] %vm283_vm2, %v261_v20 }
  0xf8   : > { %v172_v30 = vpop.permute.xlu0 %171  ;;  %v170_v31 = vpop.permute.xlu1 %169 }
  0xf9   : > { %191 = vst.msk [vmem:[#allocation2 + $0x3a] sm:$0xff] %vm185_vm0, %v172_v30  ;;  %190 = vst.msk [vmem:[#allocation2 + $0x32] sm:$0xff] %vm185_vm0, %v170_v31 }
  0xfa   : > { %v758_v32 = vld [vmem:[#allocation2 + $0x11] ss:$0 sm:$0xff]  ;;  %v754_v33 = vld [vmem:[#allocation2 + $0x2] ss:$0 sm:$0xff]  ;;  %248 = vst.msk [vmem:[#allocation2 + $0x3a] sm:$0xff] %vm242_vm1, %v230_v14  ;;  %247 = vst.msk [vmem:[#allocation2 + $0x32] sm:$0xff] %vm242_vm1, %v225_v15 }
  0xfb   : > { %289 = vst.msk [vmem:[#allocation2 + $0x3a] sm:$0xff] %vm283_vm2, %v273_v23  ;;  %288 = vst.msk [vmem:[#allocation2 + $0x32] sm:$0xff] %vm283_vm2, %v269_v22  ;;  %v442_v22 = vstv %s441_s25 }
  0xfc   : > { %317 = vst.msk [vmem:[#allocation2] sm:$0x3] %vm316_vm3, %v754_v33  ;;  %337 = vst.msk [vmem:[#allocation2 + $0x12] sm:$0x3] %vm316_vm3, %v758_v32  ;;  %v176_v34 = vpop.permute.xlu0 %175  ;;  %v174_v35 = vpop.permute.xlu1 %173  ;;  %vm1257_vm6 = vcmp.eq.s32.totalorder %v442_v22, 1 }
  0xfd   : > { %193 = vst.msk [vmem:[#allocation2 + $0x52] sm:$0xff] %vm185_vm0, %v176_v34  ;;  %192 = vst.msk [vmem:[#allocation2 + $0x4a] sm:$0xff] %vm185_vm0, %v174_v35 }
  0xfe   : > { %v759_v36 = vld [vmem:[#allocation2 + $0x29] ss:$0 sm:$0xff]  ;;  %v755_v37 = vld [vmem:[#allocation2 + $0x1a] ss:$0 sm:$0xff]  ;;  %250 = vst.msk [vmem:[#allocation2 + $0x52] sm:$0xff] %vm242_vm1, %v240_v16  ;;  %249 = vst.msk [vmem:[#allocation2 + $0x4a] sm:$0xff] %vm242_vm1, %v235_v17 }
  0xff   : > { %291 = vst.msk [vmem:[#allocation2 + $0x52] sm:$0xff] %vm283_vm2, %v281_v25  ;;  %290 = vst.msk [vmem:[#allocation2 + $0x4a] sm:$0xff] %vm283_vm2, %v277_v24 }
 0x100   : > { %318 = vst.msk [vmem:[#allocation2 + $0x18] sm:$0x3] %vm316_vm3, %v755_v37  ;;  %338 = vst.msk [vmem:[#allocation2 + $0x2a] sm:$0x3] %vm316_vm3, %v759_v36 }
 0x102   : > { %v760_v38 = vld [vmem:[#allocation2 + $0x41] ss:$0 sm:$0xff]  ;;  %v756_v39 = vld [vmem:[#allocation2 + $0x32] ss:$0 sm:$0xff] }
 0x103   : > { %319 = vst.msk [vmem:[#allocation2 + $0x30] sm:$0x3] %vm316_vm3, %v756_v39  ;;  %339 = vst.msk [vmem:[#allocation2 + $0x42] sm:$0x3] %vm316_vm3, %v760_v38 }
 0x106   : > { %v761_v40 = vld [vmem:[#allocation2 + $0x59] ss:$0 sm:$0xff]  ;;  %v757_v41 = vld [vmem:[#allocation2 + $0x4a] ss:$0 sm:$0xff] }
 0x107   : > { %320 = vst.msk [vmem:[#allocation2 + $0x48] sm:$0x3] %vm316_vm3, %v757_v41  ;;  %340 = vst.msk [vmem:[#allocation2 + $0x5a] sm:$0x3] %vm316_vm3, %v761_v40  ;;  %v486_v40 = vstv %s485_s26 }
 0x108   : > { %vm1294_vm7 = vcmp.eq.s32.totalorder %v486_v40, 1 }
 0x10e   : > { %v1147_v42 = vld [vmem:[%s343_s19 + $0x8] sm:$0xff]  ;;  %v1149_v43 = vld [vmem:[%s343_s19] sm:$0xff]  ;;  %v1157_v45 = vld [vmem:[%s343_s19 + $0x18] sm:$0xff] }
 0x10f   : > { %366 = vrot.lane.b32.xlu0 %v1147_v42, %s960_s20  ;;  %364 = vrot.lane.b32.xlu1 %v1149_v43, %s960_s20  ;;  %v1155_v44 = vld [vmem:[%s343_s19 + $0x20] sm:$0xff]  ;;  %v1163_v46 = vld [vmem:[%s343_s19 + $0x38] sm:$0xff] }
 0x110   : > { %v1165_v47 = vld [vmem:[%s343_s19 + $0x30] sm:$0xff]  ;;  %v1173_v49 = vld [vmem:[%s343_s19 + $0x48] sm:$0xff] }
 0x111   : > { %v1171_v48 = vld [vmem:[%s343_s19 + $0x50] sm:$0xff]  ;;  %s888_s19 = scalar_lea.vmem %s887_s17, 2048 }
 0x112   : > { %p890_p3 = scmp.lt.s32.totalorder %s888_s19, %s882_s22 }
 0x113   : > { %370 = vrot.lane.b32.xlu0 %v1155_v44, %s960_s20  ;;  %368 = vrot.lane.b32.xlu1 %v1157_v45, %s960_s20 }
 0x114   : > { %p891_p9 = por %p890_p3, %p889_p1 }
 0x116   : > { %p892_p11 = pnand %p891_p9, %p885_p13 }
 0x117   : > { %374 = vrot.lane.b32.xlu0 %v1163_v46, %s960_s20  ;;  %372 = vrot.lane.b32.xlu1 %v1165_v47, %s960_s20 }
 0x11b   : > { %378 = vrot.lane.b32.xlu0 %v1171_v48, %s960_s20  ;;  %376 = vrot.lane.b32.xlu1 %v1173_v49, %s960_s20 }
 0x181   : > { %v367_v52 = vpop.permute.xlu0 %366  ;;  %v365_v53 = vpop.permute.xlu1 %364 }
 0x182   : > { %v389_v54 = vsel %vm1183_vm4, %v1147_v42, %v367_v52  ;;  %v388_v55 = vsel %vm1183_vm4, %v1149_v43, %v365_v53 }
 0x183   : > { %410 = vrot.lane.b32.xlu0 %v389_v54, %s960_s20  ;;  %408 = vrot.lane.b32.xlu1 %v388_v55, %s960_s20 }
 0x185   : > { %v371_v56 = vpop.permute.xlu0 %370  ;;  %v369_v57 = vpop.permute.xlu1 %368 }
 0x186   : > { %v391_v58 = vsel %vm1183_vm4, %v1155_v44, %v371_v56  ;;  %v390_v59 = vsel %vm1183_vm4, %v1157_v45, %v369_v57 }
 0x187   : > { %414 = vrot.lane.b32.xlu0 %v391_v58, %s960_s20  ;;  %412 = vrot.lane.b32.xlu1 %v390_v59, %s960_s20 }
 0x189   : > { %v375_v60 = vpop.permute.xlu0 %374  ;;  %v373_v61 = vpop.permute.xlu1 %372 }
 0x18a   : > { %v393_v62 = vsel %vm1183_vm4, %v1163_v46, %v375_v60  ;;  %v392_v63 = vsel %vm1183_vm4, %v1165_v47, %v373_v61 }
 0x18b   : > { %418 = vrot.lane.b32.xlu0 %v393_v62, %s960_s20  ;;  %416 = vrot.lane.b32.xlu1 %v392_v63, %s960_s20 }
 0x18d   : > { %v379_v0 = vpop.permute.xlu0 %378  ;;  %v377_v1 = vpop.permute.xlu1 %376 }
 0x18e   : > { %v395_v2 = vsel %vm1183_vm4, %v1171_v48, %v379_v0  ;;  %v394_v3 = vsel %vm1183_vm4, %v1173_v49, %v377_v1 }
 0x18f   : > { %422 = vrot.lane.b32.xlu0 %v395_v2, %s960_s20  ;;  %420 = vrot.lane.b32.xlu1 %v394_v3, %s960_s20  ;;  %v530_v2 = vstv %s529_s30 }
 0x190   : > { %vm1331_vm8 = vcmp.eq.s32.totalorder %v530_v2, 1 }
 0x1f5   : > { %v411_v6 = vpop.permute.xlu0 %410  ;;  %v409_v7 = vpop.permute.xlu1 %408 }
 0x1f6   : > { %v433_v8 = vsel %vm1220_vm5, %v1147_v42, %v411_v6  ;;  %v432_v9 = vsel %vm1220_vm5, %v1149_v43, %v409_v7 }
 0x1f7   : > { %454 = vrot.lane.b32.xlu0 %v433_v8, %s960_s20  ;;  %452 = vrot.lane.b32.xlu1 %v432_v9, %s960_s20 }
 0x1f9   : > { %v415_v10 = vpop.permute.xlu0 %414  ;;  %v413_v11 = vpop.permute.xlu1 %412 }
 0x1fa   : > { %v435_v12 = vsel %vm1220_vm5, %v1155_v44, %v415_v10  ;;  %v434_v13 = vsel %vm1220_vm5, %v1157_v45, %v413_v11 }
 0x1fb   : > { %458 = vrot.lane.b32.xlu0 %v435_v12, %s960_s20  ;;  %456 = vrot.lane.b32.xlu1 %v434_v13, %s960_s20 }
 0x1fd   : > { %v419_v14 = vpop.permute.xlu0 %418  ;;  %v417_v15 = vpop.permute.xlu1 %416 }
 0x1fe   : > { %v437_v16 = vsel %vm1220_vm5, %v1163_v46, %v419_v14  ;;  %v436_v17 = vsel %vm1220_vm5, %v1165_v47, %v417_v15 }
 0x1ff   : > { %462 = vrot.lane.b32.xlu0 %v437_v16, %s960_s20  ;;  %460 = vrot.lane.b32.xlu1 %v436_v17, %s960_s20 }
 0x201   : > { %v423_v18 = vpop.permute.xlu0 %422  ;;  %v421_v19 = vpop.permute.xlu1 %420 }
 0x202   : > { %v439_v20 = vsel %vm1220_vm5, %v1171_v48, %v423_v18  ;;  %v438_v21 = vsel %vm1220_vm5, %v1173_v49, %v421_v19 }
 0x203   : > { %466 = vrot.lane.b32.xlu0 %v439_v20, %s960_s20  ;;  %464 = vrot.lane.b32.xlu1 %v438_v21, %s960_s20  ;;  %v574_v20 = vstv %s573_s5 }
 0x204   : > { %vm1368_vm9 = vcmp.eq.s32.totalorder %v574_v20, 1 }
 0x269   : > { %v455_v24 = vpop.permute.xlu0 %454  ;;  %v453_v25 = vpop.permute.xlu1 %452 }
 0x26a   : > { %v477_v26 = vsel %vm1257_vm6, %v1147_v42, %v455_v24  ;;  %v476_v27 = vsel %vm1257_vm6, %v1149_v43, %v453_v25 }
 0x26b   : > { %498 = vrot.lane.b32.xlu0 %v477_v26, %s960_s20  ;;  %496 = vrot.lane.b32.xlu1 %v476_v27, %s960_s20 }
 0x26d   : > { %v459_v28 = vpop.permute.xlu0 %458  ;;  %v457_v29 = vpop.permute.xlu1 %456 }
 0x26e   : > { %v479_v30 = vsel %vm1257_vm6, %v1155_v44, %v459_v28  ;;  %v478_v31 = vsel %vm1257_vm6, %v1157_v45, %v457_v29 }
 0x26f   : > { %502 = vrot.lane.b32.xlu0 %v479_v30, %s960_s20  ;;  %500 = vrot.lane.b32.xlu1 %v478_v31, %s960_s20 }
 0x271   : > { %v463_v32 = vpop.permute.xlu0 %462  ;;  %v461_v33 = vpop.permute.xlu1 %460 }
 0x272   : > { %v481_v34 = vsel %vm1257_vm6, %v1163_v46, %v463_v32  ;;  %v480_v35 = vsel %vm1257_vm6, %v1165_v47, %v461_v33 }
 0x273   : > { %506 = vrot.lane.b32.xlu0 %v481_v34, %s960_s20  ;;  %504 = vrot.lane.b32.xlu1 %v480_v35, %s960_s20 }
 0x275   : > { %v467_v36 = vpop.permute.xlu0 %466  ;;  %v465_v37 = vpop.permute.xlu1 %464 }
 0x276   : > { %v483_v38 = vsel %vm1257_vm6, %v1171_v48, %v467_v36  ;;  %v482_v39 = vsel %vm1257_vm6, %v1173_v49, %v465_v37 }
 0x277   : > { %510 = vrot.lane.b32.xlu0 %v483_v38, %s960_s20  ;;  %508 = vrot.lane.b32.xlu1 %v482_v39, %s960_s20 }
 0x2dd   : > { %v499_v50 = vpop.permute.xlu0 %498  ;;  %v497_v51 = vpop.permute.xlu1 %496 }
 0x2de   : > { %v521_v52 = vsel %vm1294_vm7, %v1147_v42, %v499_v50  ;;  %v520_v53 = vsel %vm1294_vm7, %v1149_v43, %v497_v51 }
 0x2df   : > { %542 = vrot.lane.b32.xlu0 %v521_v52, %s960_s20  ;;  %540 = vrot.lane.b32.xlu1 %v520_v53, %s960_s20 }
 0x2e1   : > { %v503_v54 = vpop.permute.xlu0 %502  ;;  %v501_v55 = vpop.permute.xlu1 %500 }
 0x2e2   : > { %v523_v56 = vsel %vm1294_vm7, %v1155_v44, %v503_v54  ;;  %v522_v57 = vsel %vm1294_vm7, %v1157_v45, %v501_v55 }
 0x2e3   : > { %546 = vrot.lane.b32.xlu0 %v523_v56, %s960_s20  ;;  %544 = vrot.lane.b32.xlu1 %v522_v57, %s960_s20 }
 0x2e5   : > { %v507_v58 = vpop.permute.xlu0 %506  ;;  %v505_v59 = vpop.permute.xlu1 %504 }
 0x2e6   : > { %v525_v60 = vsel %vm1294_vm7, %v1163_v46, %v507_v58  ;;  %v524_v61 = vsel %vm1294_vm7, %v1165_v47, %v505_v59 }
 0x2e7   : > { %550 = vrot.lane.b32.xlu0 %v525_v60, %s960_s20  ;;  %548 = vrot.lane.b32.xlu1 %v524_v61, %s960_s20 }
 0x2e9   : > { %v511_v62 = vpop.permute.xlu0 %510  ;;  %v509_v63 = vpop.permute.xlu1 %508 }
 0x2ea   : > { %v527_v0 = vsel %vm1294_vm7, %v1171_v48, %v511_v62  ;;  %v526_v1 = vsel %vm1294_vm7, %v1173_v49, %v509_v63 }
 0x2eb   : > { %554 = vrot.lane.b32.xlu0 %v527_v0, %s960_s20  ;;  %552 = vrot.lane.b32.xlu1 %v526_v1, %s960_s20 }
 0x351   : > { %v543_v4 = vpop.permute.xlu0 %542  ;;  %v541_v5 = vpop.permute.xlu1 %540 }
 0x352   : > { %v565_v6 = vsel %vm1331_vm8, %v1147_v42, %v543_v4  ;;  %v564_v7 = vsel %vm1331_vm8, %v1149_v43, %v541_v5 }
 0x353   : > { %586 = vrot.lane.b32.xlu0 %v565_v6, %s960_s20  ;;  %584 = vrot.lane.b32.xlu1 %v564_v7, %s960_s20 }
 0x355   : > { %v547_v8 = vpop.permute.xlu0 %546  ;;  %v545_v9 = vpop.permute.xlu1 %544 }
 0x356   : > { %v567_v10 = vsel %vm1331_vm8, %v1155_v44, %v547_v8  ;;  %v566_v11 = vsel %vm1331_vm8, %v1157_v45, %v545_v9 }
 0x357   : > { %590 = vrot.lane.b32.xlu0 %v567_v10, %s960_s20  ;;  %588 = vrot.lane.b32.xlu1 %v566_v11, %s960_s20 }
 0x359   : > { %v551_v12 = vpop.permute.xlu0 %550  ;;  %v549_v13 = vpop.permute.xlu1 %548 }
 0x35a   : > { %v569_v14 = vsel %vm1331_vm8, %v1163_v46, %v551_v12  ;;  %v568_v15 = vsel %vm1331_vm8, %v1165_v47, %v549_v13 }
 0x35b   : > { %594 = vrot.lane.b32.xlu0 %v569_v14, %s960_s20  ;;  %592 = vrot.lane.b32.xlu1 %v568_v15, %s960_s20 }
 0x35d   : > { %v555_v16 = vpop.permute.xlu0 %554  ;;  %v553_v17 = vpop.permute.xlu1 %552 }
 0x35e   : > { %v571_v18 = vsel %vm1331_vm8, %v1171_v48, %v555_v16  ;;  %v570_v19 = vsel %vm1331_vm8, %v1173_v49, %v553_v17 }
 0x35f   : > { %598 = vrot.lane.b32.xlu0 %v571_v18, %s960_s20  ;;  %596 = vrot.lane.b32.xlu1 %v570_v19, %s960_s20 }
 0x3c5   : > { %v587_v22 = vpop.permute.xlu0 %586  ;;  %v585_v23 = vpop.permute.xlu1 %584 }
 0x3c6   : > { %v609_v24 = vsel %vm1368_vm9, %v1147_v42, %v587_v22  ;;  %v608_v25 = vsel %vm1368_vm9, %v1149_v43, %v585_v23 }
 0x3c7   : > { %626 = vrot.lane.b32.xlu0 %v609_v24, %s961_s6  ;;  %624 = vrot.lane.b32.xlu1 %v608_v25, %s961_s6 }
 0x3c9   : > { %v591_v26 = vpop.permute.xlu0 %590  ;;  %v589_v27 = vpop.permute.xlu1 %588 }
 0x3ca   : > { %v611_v28 = vsel %vm1368_vm9, %v1155_v44, %v591_v26  ;;  %v610_v29 = vsel %vm1368_vm9, %v1157_v45, %v589_v27 }
 0x3cb   : > { %630 = vrot.lane.b32.xlu0 %v611_v28, %s961_s6  ;;  %628 = vrot.lane.b32.xlu1 %v610_v29, %s961_s6 }
 0x3cd   : > { %v595_v42 = vpop.permute.xlu0 %594  ;;  %v593_v30 = vpop.permute.xlu1 %592 }
 0x3ce   : > { %v613_v43 = vsel %vm1368_vm9, %v1163_v46, %v595_v42  ;;  %v612_v31 = vsel %vm1368_vm9, %v1165_v47, %v593_v30 }
 0x3cf   : > { %634 = vrot.lane.b32.xlu0 %v613_v43, %s961_s6  ;;  %632 = vrot.lane.b32.xlu1 %v612_v31, %s961_s6 }
 0x3d1   : > { %v599_v44 = vpop.permute.xlu0 %598  ;;  %v597_v32 = vpop.permute.xlu1 %596 }
 0x3d2   : > { %v615_v45 = vsel %vm1368_vm9, %v1171_v48, %v599_v44  ;;  %v614_v33 = vsel %vm1368_vm9, %v1173_v49, %v597_v32 }
 0x3d3   : > { %638 = vrot.lane.b32.xlu0 %v615_v45, %s961_s6  ;;  %636 = vrot.lane.b32.xlu1 %v614_v33, %s961_s6 }
 0x439   : > { %v627_v46 = vpop.permute.xlu0 %626  ;;  %v625_v34 = vpop.permute.xlu1 %624 }
 0x43a   : > { %650 = vst.msk [vmem:[%s144_s8 + $0x8] sm:$0xff] %vm648_vm10, %v627_v46  ;;  %649 = vst.msk [vmem:[%s144_s8] sm:$0xff] %vm648_vm10, %v625_v34 }
 0x43d   : > { %v631_v47 = vpop.permute.xlu0 %630  ;;  %v629_v35 = vpop.permute.xlu1 %628 }
 0x43e   : > { %652 = vst.msk [vmem:[%s144_s8 + $0x18] sm:$0xff] %vm648_vm10, %v631_v47  ;;  %651 = vst.msk [vmem:[%s144_s8 + $0x10] sm:$0xff] %vm648_vm10, %v629_v35 }
 0x441   : > { %v635_v48 = vpop.permute.xlu0 %634  ;;  %v633_v49 = vpop.permute.xlu1 %632 }
 0x442   : > { %654 = vst.msk [vmem:[%s144_s8 + $0x28] sm:$0xff] %vm648_vm10, %v635_v48  ;;  %653 = vst.msk [vmem:[%s144_s8 + $0x20] sm:$0xff] %vm648_vm10, %v633_v49 }
 0x445   : > { %v639_v36 = vpop.permute.xlu0 %638  ;;  %v637_v37 = vpop.permute.xlu1 %636 }
 0x446   : > { %656 = vst.msk [vmem:[%s144_s8 + $0x38] sm:$0xff] %vm648_vm10, %v639_v36  ;;  %655 = vst.msk [vmem:[%s144_s8 + $0x30] sm:$0xff] %vm648_vm10, %v637_v37 }
 0x447   : > { %895 = shalt.err (!%p892_p11)
}
 0x448   : > { %s896_s20 = scalar_lea.hbm %s1410_s18, 1024  ;;  %s900_s24 = scalar_lea.hbm %s1458_s3, 2048 }
 0x449   : > { %p897_p0 = scmp.ne.s32.totalorder %s1410_s18, %s896_s20  ;;  %p901_p7 = scmp.lt.u32.totalorder %s1410_s18, %s1458_s3 }
 0x44a   : > { %p902_p2 = scmp.lt.u32.totalorder %s900_s24, %s896_s20  ;;  %p904_p8 = scmp.lt.u32.totalorder %s896_s20, %s1410_s18 }
 0x44b   : > { %p898_p5 = pnand %p897_p0, %p1478_p10 }
 0x44c   : > { %p903_p4 = por %p902_p2, %p901_p7 }
 0x44d   : > { %p899_p6 = pneg %p898_p5 }
 0x44e   : > { %p905_p12 = por %p904_p8, %p903_p4 }
 0x450   : > { %p906_p13 = pnand %p905_p12, %p899_p6 }
 0x452   : > { %909 = shalt.err (!%p906_p13)
}
 0x453   : > { %s963_s30 = smov 128   ;;  %s964_s5 = smov 8  }
 0x454   : > { %771 = dma.vmem_to_hbm [thread:$0]  (%p1478_p10), %s1403_s12, 1024, %s1410_s18, %s658_s29, %s963_s30, %s963_s30, %s964_s5  }
 0x455 PF: > { %s686_s6 = sand.u32 1, %s938_s0   ;;  %p1479_p1 = scmp.ne.s32.totalorder %s1464_s11, 0 }
 0x456   : > { %p1480_p3 = scmp.ge.s32.totalorder %s950_s28, 2  ;;  %s687_s8 = scalar_lea.sflag [#allocation8], %s686_s6 }
 0x458   : > { %p778_p9 = pnand %p1480_p3, %p1479_p1 }
 0x45a   : > { %933 = dma.done.wait (!%p778_p9), %s687_s8, 1024  }
 0x45b   : > { %935 = vsyncadd (!%p778_p9), %s687_s8, 4294966272  ;;  %p24_p11 = scmp.ge.s32.totalorder %s1025_s4, 4   ;;  %s1481_s0 = smov %s942_s1 }
 0x45c   : > { %s1482_s1 = smov %s946_s27  ;;  %s1483_s27 = smov %s1037_s7 }
 0x45d   : > { %s1484_s28 = smov %s1025_s4  ;;  %26 = sbr.rel (!%p24_p11) target bundleno = 27 (0x1b), region = 70 }
 0x464   :  { %692 = vsyncpa [#allocation7], 1 }
 0x465   :  { %694 = vsyncpa [#allocation7 + $0x1], 1 }
 0x466   :  { %695 = vsyncpa [#allocation8], 1 }
 0x467   :  { %697 = vsyncpa [#allocation8 + $0x1], 1 }

</bundles_post_ra>
